<compile_context>
chip_gen: v7x
topology: tpu7x:2x2x1
jax: 0.10.0
libtpu: 0.0.40
codegen_flags: <defaults>
</compile_context>

<pallas_src>
import jax
import jax.numpy as jnp
from jax.experimental import pallas as pl
from jax.experimental.pallas import tpu as pltpu


def _h_swish_kernel(x_ref, o_ref):
    x = x_ref[...]
    # relu6(x + 3) / 6  ->  clamp(x + 3, 0, 6) * (1/6)   (VPU only; mem-bound)
    hs = jnp.clip(x + 3.0, 0.0, 6.0) * (1.0 / 6.0)
    o_ref[...] = (x * hs).astype(o_ref.dtype)


def _h_swish_ref(x):
    return (x * (jnp.clip(x + 3.0, 0.0, 6.0) * (1.0 / 6.0))).astype(x.dtype)


def _round_up(a, b):
    return ((a + b - 1) // b) * b


def _chip_config():
    """Return (target_block_bytes, multi_tc) gated by TPU generation."""
    kind = ""
    try:
        kind = jax.devices()[0].device_kind.lower()
    except Exception:
        pass
    if "v7" in kind:
        # v7x: 2 TCs/chip, ~3.2 TB/s HBM -> grow blocks to hide per-step
        # overhead; 4 MiB in+out double-buffered = 16 MiB, well inside the
        # 32 MiB scoped default / 64 MiB physical VMEM.
        return 4 * 1024 * 1024, True
    # v5e: 16 MiB scoped-VMEM default -> keep 2 MiB (8 MiB double-buffered).
    # v6e / others: 2 MiB already sits on the HBM-roofline plateau.
    return 2 * 1024 * 1024, False


def h_swish(x, *, target_block_bytes=None, donate=False):
    """Elementwise hard-swish. x: any shape (e.g. NCHW), any float dtype."""
    orig_shape = x.shape
    dtype = x.dtype
    total = x.size
    if total == 0:
        return x

    chip_block_bytes, multi_tc = _chip_config()
    if target_block_bytes is None:
        target_block_bytes = chip_block_bytes

    if total % 128 != 0:
        # Ragged total: padding + slicing would add two extra full HBM passes,
        # erasing the kernel's benefit for a purely mem-bound op.  A single
        # fused XLA elementwise pass is already at the roofline here.
        return _h_swish_ref(x)

    itemsize = jnp.dtype(dtype).itemsize
    # Sublane multiple respecting dtype packing (f32:8, bf16:16, int8/fp8:32).
    sub = {4: 8, 2: 16, 1: 32}.get(itemsize, 8)

    # --- lane-dense 2D slab (rows, lanes); pure reshape, no data copy ---
    lanes = 128
    for w in (1024, 512, 256, 128):            # prefer wide lanes AND rows % sub == 0
        if total % w == 0 and (total // w) % sub == 0:
            lanes = w
            break
    else:
        for w in (1024, 512, 256, 128):        # fall back to any dividing width
            if total % w == 0:
                lanes = w
                break

    rows = total // lanes
    x2d = x.reshape(rows, lanes)

    # --- block sizing ---
    if rows <= sub:
        block_rows = rows                      # full-dim block; no padding games
    else:
        tgt_rows = max(sub, target_block_bytes // (lanes * itemsize))
        if multi_tc:
            # Multi-TC chips only: split so both TensorCores get work.
            tgt_rows = min(tgt_rows, max(sub, pl.cdiv(rows, 2)))
        block_rows = max(sub, (tgt_rows // sub) * sub)
        block_rows = min(block_rows, _round_up(rows, sub))

    n_steps = pl.cdiv(rows, block_rows)
    if multi_tc and n_steps > 1 and n_steps % 2 == 1:
        # v7x: odd step count leaves one TC idle for a whole block ->
        # shrink blocks to make the step count even (balanced 2-TC split).
        block_rows = max(sub, _round_up(pl.cdiv(rows, n_steps + 1), sub))
        block_rows = min(block_rows, _round_up(rows, sub))
        n_steps = pl.cdiv(rows, block_rows)

    grid = (n_steps,)                          # partial last block handled by Pallas

    call_kwargs = {}
    if donate:
        # Halves peak HBM footprint when the caller donates x; bytes streamed
        # are unchanged (still 1 read + 1 write).
        call_kwargs["input_output_aliases"] = {0: 0}

    out2d = pl.pallas_call(
        _h_swish_kernel,
        out_shape=jax.ShapeDtypeStruct((rows, lanes), dtype),
        grid_spec=pltpu.PrefetchScalarGridSpec(
            num_scalar_prefetch=0,
            grid=grid,
            in_specs=[pl.BlockSpec((block_rows, lanes), lambda i: (i, 0))],
            out_specs=pl.BlockSpec((block_rows, lanes), lambda i: (i, 0)),
        ),
        compiler_params=pltpu.CompilerParams(
            dimension_semantics=("parallel",),
        ),
        **call_kwargs,
    )(x2d)

    return out2d.reshape(orig_shape)


if __name__ == "__main__":
    key = jax.random.PRNGKey(0)

    # NCHW, matching the PyTorch convention: batch=2, channels=4, 16x16 spatial.
    x = jax.random.normal(key, (2, 4, 16, 16), dtype=jnp.float32) * 4.0
    out = jax.block_until_ready(h_swish(x))
    ref = _h_swish_ref(x)
    assert out.shape == x.shape and out.dtype == x.dtype
    assert jnp.allclose(out, ref, atol=1e-6, rtol=1e-6)

    # Larger aligned slab (exercises wide-lane path / multi-row blocks).
    k2 = jax.random.PRNGKey(1)
    y = jax.random.normal(k2, (2, 4, 32, 128), dtype=jnp.float32) * 4.0
    out_y = jax.block_until_ready(h_swish(y))
    assert jnp.allclose(out_y, _h_swish_ref(y), atol=1e-6, rtol=1e-6)

    # Ragged total (not a multiple of 128) -> single-pass fused fallback.
    k3 = jax.random.PRNGKey(2)
    z = jax.random.normal(k3, (3, 5, 7), dtype=jnp.float32) * 4.0
    out_z = jax.block_until_ready(h_swish(z))
    assert out_z.shape == z.shape and out_z.dtype == z.dtype
    assert jnp.allclose(out_z, _h_swish_ref(z), atol=1e-6, rtol=1e-6)

    print("KERNEL_OK")
</pallas_src>

<mosaic_0001>
module attributes {stable_mosaic.version = 11 : i64} {
  func.func @_h_swish_kernel(%arg0: i32, %arg1: memref<8x256xf32, #tpu.memory_space<vmem>>, %arg2: memref<8x256xf32, #tpu.memory_space<vmem>>) attributes {dimension_semantics = [#tpu.dimension_semantics<parallel>], iteration_bounds = array<i64: 1>, scalar_prefetch = 0 : i64, scratch_operands = 0 : i64, tpu.core_type = #tpu.core_type<tc>, window_params = [{transform_indices = @transform_0, window_bounds = array<i64: 8, 256>}, {transform_indices = @transform_1, window_bounds = array<i64: 8, 256>}]} {
    %c0 = arith.constant 0 : index
    %c0_0 = arith.constant 0 : index
    %0 = vector.load %arg1[%c0, %c0_0] : memref<8x256xf32, #tpu.memory_space<vmem>>, vector<8x256xf32>
    %cst = arith.constant 3.000000e+00 : f32
    %1 = vector.broadcast %cst : f32 to vector<8x256xf32>
    %2 = arith.addf %0, %1 : vector<8x256xf32>
    %cst_1 = arith.constant 0.000000e+00 : f32
    %cst_2 = arith.constant 6.000000e+00 : f32
    %3 = vector.broadcast %cst_1 : f32 to vector<8x256xf32>
    %4 = arith.maximumf %3, %2 : vector<8x256xf32>
    %5 = vector.broadcast %cst_2 : f32 to vector<8x256xf32>
    %6 = arith.minimumf %5, %4 : vector<8x256xf32>
    %cst_3 = arith.constant 0.166666672 : f32
    %7 = vector.broadcast %cst_3 : f32 to vector<8x256xf32>
    %8 = arith.mulf %6, %7 : vector<8x256xf32>
    %9 = arith.mulf %0, %8 : vector<8x256xf32>
    %c0_4 = arith.constant 0 : index
    %c0_5 = arith.constant 0 : index
    %10 = vector.load %arg2[%c0_4, %c0_5] : memref<8x256xf32, #tpu.memory_space<vmem>>, vector<8x256xf32>
    tpu.vector_store %arg2[%c0_4, %c0_5], %9 {strides = array<i32>} : memref<8x256xf32, #tpu.memory_space<vmem>>, vector<8x256xf32>,
    return
  }
  func.func @transform_0(%arg0: i32) -> (i32, i32) {
    %c0_i32 = arith.constant 0 : i32
    %c0_i32_0 = arith.constant 0 : i32
    return %arg0, %c0_i32 : i32, i32
  }
  func.func @transform_1(%arg0: i32) -> (i32, i32) {
    %c0_i32 = arith.constant 0 : i32
    %c0_i32_0 = arith.constant 0 : i32
    return %arg0, %c0_i32 : i32, i32
  }
}

</mosaic_0001>

<bundles_post_ra>
// kernel: tpu_custom_call.1
= control target key start
LH: loop header
LB: loop body
LE: loop exit
PB: predicated region body
PF: predicated region fallthrough
CT: control target
= control target key end

     0   :  { %6 = vsyncpa [#allocation3], 0  ;;  %s136_s0 = inlined_call_operand.hbm [shape: f32[8,256], index: 0, kind: input, shape index: {}]   ;;  %s137_s1 = inlined_call_operand.hbm [shape: f32[8,256], index: 1, kind: output, shape index: {}]  }
   0x1   :  { %7 = vsyncpa [#allocation4], 0  ;;  %s100_s6 = smov [#allocation2]   ;;  %s52_s10 = scalar_lea.hbm %s136_s0, 256 }
   0x2   :  { %s14_s7 = sshll.u32 %s100_s6, 4  ;;  %p53_p0 = scmp.ne.s32.totalorder %s136_s0, %s52_s10  ;;  %s15_s7 = int_to_ptr.vmem [resolvable:$true] %s14_s7 }
   0x3   :  { %p56_p1 = scmp.lt.u32.totalorder %s52_s10, %s136_s0 }
   0x5   :  { %p58_p2 = pnand %p56_p1, %p53_p0 }
   0x7   :  { %61 = shalt.err (!%p58_p2)
}
   0x8   :  { %s62_s15 = scalar_lea.vmem %s15_s7, 256  ;;  %p67_p4 = scmp.lt.s32.totalorder %s15_s7, %s15_s7 }
   0x9   :  { %p63_p3 = scmp.ne.s32.totalorder %s15_s7, %s62_s15  ;;  %p68_p5 = scmp.lt.s32.totalorder %s62_s15, %s62_s15 }
   0xb   :  { %p69_p6 = por %p68_p5, %p67_p4 }
   0xd   :  { %p70_p7 = pnand %p69_p6, %p63_p3 }
   0xf   :  { %73 = shalt.err (!%p70_p7)
}
  0x10   :  { %17 = dma.hbm_to_vmem [thread:$0]  %s136_s0, 256, %s15_s7, [#allocation3]  }
  0x11   :  { %96 = dma.done.wait [#allocation3], 256  }
  0x12   :  { %97 = vsyncadd [#allocation3], 4294967040  ;;  %v21_v0 = vld [vmem:[#allocation2] sm:$0xff]  ;;  %v22_v1 = vld [vmem:[#allocation2 + $0x8] sm:$0xff]  ;;  %s101_s18 = smov [#allocation5]  }
  0x13   :  { %v23_v2 = vadd.f32 3.0, %v21_v0  ;;  %v24_v3 = vadd.f32 3.0, %v22_v1  ;;  %s41_s19 = sshll.u32 %s101_s18, 4  ;;  %s42_s19 = int_to_ptr.vmem [resolvable:$true] %s41_s19 }
  0x14   :  { %s74_s0 = scalar_lea.vmem %s42_s19, 256  ;;  %p79_p9 = scmp.lt.s32.totalorder %s42_s19, %s42_s19 }
  0x15   :  { %v25_v4 = vmax.f32 %v23_v2, 0.0  ;;  %v26_v5 = vmax.f32 %v24_v3, 0.0  ;;  %p75_p8 = scmp.ne.s32.totalorder %s42_s19, %s74_s0  ;;  %p80_p10 = scmp.lt.s32.totalorder %s74_s0, %s74_s0 }
  0x17   :  { %v27_v6 = vmin.f32 %v25_v4, 6.0  ;;  %v28_v7 = vmin.f32 %v26_v5, 6.0  ;;  %p81_p11 = por %p80_p10, %p79_p9 }
  0x19   :  { %v29_v8 = vmul.f32 0.16666667, %v27_v6  ;;  %v30_v9 = vmul.f32 0.16666667, %v28_v7  ;;  %p82_p12 = pnand %p81_p11, %p75_p8 }
  0x1b   :  { %v31_v10 = vmul.f32 %v29_v8, %v21_v0  ;;  %v32_v11 = vmul.f32 %v30_v9, %v22_v1 }
  0x1d   :  { %33 = vst [vmem:[#allocation5] sm:$0xff] %v31_v10  ;;  %34 = vst [vmem:[#allocation5 + $0x8] sm:$0xff] %v32_v11 }
  0x1e   :  { %85 = shalt.err (!%p82_p12)
}
  0x1f   :  { %s86_s22 = scalar_lea.hbm %s137_s1, 256 }
  0x20   :  { %p87_p13 = scmp.ne.s32.totalorder %s137_s1, %s86_s22  ;;  %p90_p0 = scmp.lt.u32.totalorder %s86_s22, %s137_s1 }
  0x22   :  { %p92_p1 = pnand %p90_p0, %p87_p13 }
  0x24   :  { %95 = shalt.err (!%p92_p1)
}
  0x25   :  { %44 = dma.vmem_to_hbm [thread:$0]  %s42_s19, 256, %s137_s1, [#allocation4]  }
  0x26   :  { %98 = dma.done.wait [#allocation4], 256  }
  0x27   :  { %99 = vsyncadd [#allocation4], 4294967040 }
  0x28   :  { %48 = vsyncpa [#allocation3], 1 }
  0x29   :  { %49 = vsyncpa [#allocation4], 1 }

</bundles_post_ra>
